<compile_context>
chip_gen: v5e
topology: v5e:2x2
jax: 0.10.0
libtpu: 0.0.40
codegen_flags: <defaults>
</compile_context>

<pallas_src>
import jax
import jax.numpy as jnp
from jax.experimental import pallas as pl
from jax.experimental.pallas import tpu as pltpu


# ----------------------------------------------------------------------------
# Pallas kernel: one batch tile of the Actor MLP
#   a   = ReLU(x @ W1 + b1)              # input layer  (activation_funcs[0] = ReLU)
#   a   = ReLU(a @ W2 + b2)              # hidden layer (num_hid_layers=2 -> 1 hidden connection)
#   out = max_action * tanh(a @ W3 + b3) # output layer
# ----------------------------------------------------------------------------
def actor_mlp_kernel(x_ref, w1_ref, b1_ref, w2_ref, b2_ref, w3_ref, b3_ref,
                     ma_ref, out_ref):
    # bf16 (or f32) operands straight into the MXU, f32 accumulation.
    a = jnp.dot(x_ref[...], w1_ref[...], preferred_element_type=jnp.float32)
    a = jnp.maximum(a + b1_ref[...], 0.0).astype(w2_ref.dtype)

    a = jnp.dot(a, w2_ref[...], preferred_element_type=jnp.float32)
    a = jnp.maximum(a + b2_ref[...], 0.0).astype(w3_ref.dtype)

    o = jnp.dot(a, w3_ref[...], preferred_element_type=jnp.float32) + b3_ref[...]
    # A (=action_dim) is typically < 128 lanes -> masked vst; acceptable since
    # the output is tiny relative to the rest of the pipeline.
    out_ref[...] = (ma_ref[0, 0] * jnp.tanh(o)).astype(out_ref.dtype)


def _vmem_limit_bytes(tb, d, h, a, w_itemsize, x_itemsize):
    """Rough VMEM footprint: resident weights + double-buffered I/O tiles
    + f32 intermediate activations the compiler may spill. 2x headroom,
    clamped to stay inside v7x's scoped budget."""
    weights = (d * h + h * h + h * a) * w_itemsize + (2 * h + a) * 4
    io = 2 * tb * d * x_itemsize + 2 * tb * a * 4
    inter = 2 * tb * h * 4
    est = 2 * (weights + io + inter)
    return int(min(max(est, 8 * 1024 * 1024), 32 * 1024 * 1024))


def actor_forward(state_with_fake, params, max_action, *, block_batch=256):
    """Actor MLP forward in a single batch-gridded Pallas kernel.

    state_with_fake: [B, D] (fake features appended, permutation applied —
                     identity here since permutation is None).
    params: w1 [D,H], b1 [1,H], w2 [H,H], b2 [1,H], w3 [H,A], b3 [1,A];
            weights bf16 (masks already multiplied in), biases f32.
    """
    B, D = state_with_fake.shape
    H = params["w1"].shape[1]
    A = params["w3"].shape[1]

    w_dtype = params["w1"].dtype
    x = state_with_fake.astype(w_dtype)

    # Batch tile: full batch if it fits in one tile, otherwise a multiple of 8
    # sublanes (the (8,128) rule applies once the batch axis is tiled).
    TB = min(block_batch, B)
    if TB < B:
        TB = max(8, (TB // 8) * 8)
    n_blocks = pl.cdiv(B, TB)
    Bp = n_blocks * TB
    if Bp != B:
        x = jnp.pad(x, ((0, Bp - B), (0, 0)))

    ma = jnp.full((1, 1), max_action, dtype=jnp.float32)

    out = pl.pallas_call(
        actor_mlp_kernel,
        out_shape=jax.ShapeDtypeStruct((Bp, A), jnp.float32),
        grid=(n_blocks,),
        in_specs=[
            pl.BlockSpec((TB, D), lambda i: (i, 0)),   # x: streamed / double-buffered
            pl.BlockSpec((D, H), lambda i: (0, 0)),    # W1: resident in VMEM
            pl.BlockSpec((1, H), lambda i: (0, 0)),    # b1
            pl.BlockSpec((H, H), lambda i: (0, 0)),    # W2: resident
            pl.BlockSpec((1, H), lambda i: (0, 0)),    # b2
            pl.BlockSpec((H, A), lambda i: (0, 0)),    # W3: resident
            pl.BlockSpec((1, A), lambda i: (0, 0)),    # b3
            pl.BlockSpec(memory_space=pltpu.MemorySpace.SMEM),  # max_action scalar
        ],
        out_specs=pl.BlockSpec((TB, A), lambda i: (i, 0)),
        compiler_params=pltpu.CompilerParams(
            dimension_semantics=("parallel",),  # 2 TCs on v7x; no-op on v5e/v6e
            vmem_limit_bytes=_vmem_limit_bytes(
                TB, D, H, A, jnp.dtype(w_dtype).itemsize,
                jnp.dtype(x.dtype).itemsize),
        ),
    )(x, params["w1"], params["b1"], params["w2"], params["b2"],
      params["w3"], params["b3"], ma)

    return out[:B] if Bp != B else out


# ----------------------------------------------------------------------------
# Deterministic parameter / mask construction (mimics __init__)
# ----------------------------------------------------------------------------
def make_actor_params(key, dim_state_with_fake, num_hid_neurons, action_dim,
                      global_sparsity, param_dtype=jnp.bfloat16):
    k1, k2, k3, km = jax.random.split(key, 4)

    def linear_init(k, fan_in, fan_out):
        # PyTorch nn.Linear default: U(-1/sqrt(fan_in), 1/sqrt(fan_in))
        bound = 1.0 / jnp.sqrt(fan_in)
        kw, kb = jax.random.split(k)
        w = jax.random.uniform(kw, (fan_in, fan_out), jnp.float32, -bound, bound)
        b = jax.random.uniform(kb, (1, fan_out), jnp.float32, -bound, bound)
        return w, b

    w1, b1 = linear_init(k1, dim_state_with_fake, num_hid_neurons)
    w2, b2 = linear_init(k2, num_hid_neurons, num_hid_neurons)
    w3, b3 = linear_init(k3, num_hid_neurons, action_dim)

    # Sparsity: input/output layers kept dense (input_layer_dense /
    # output_layer_dense = True); hidden layer masked at init (weight *= mask).
    # TODO(synk): sp.compute_sparsity_per_layer / sp.initialize_mask replaced
    # by a plain Bernoulli mask; the masked matmul is still dense on the MXU.
    hid_mask = (jax.random.uniform(km, w2.shape) >= global_sparsity).astype(jnp.float32)
    w2 = w2 * hid_mask

    # Weights stored in bf16 (half the DMA bytes, 2x MXU issue rate on
    # v6e/v7x); biases stay f32 for the f32 epilogue.
    return dict(
        w1=w1.astype(param_dtype), b1=b1,
        w2=w2.astype(param_dtype), b2=b2,
        w3=w3.astype(param_dtype), b3=b3,
    )


def add_fake_features(state, num_fake_features, fake_noise_std, key):
    # Glue equivalent of utils.add_fake_features: append Gaussian noise columns.
    # TODO(synk): utils.setup_noise_generator(load_noise_distribution) is
    # approximated by a Gaussian; fusing this into the kernel via pltpu.prng_*
    # is only worthwhile for very large, HBM-bound batches.
    if num_fake_features == 0:
        return state
    noise = fake_noise_std * jax.random.normal(
        key, (state.shape[0], num_fake_features), jnp.float32)
    return jnp.concatenate([state, noise], axis=1)


if __name__ == "__main__":
    # Small, module-consistent shapes; H = module default (MXU/lane aligned).
    batch = 64
    state_dim = 12
    num_fake_features = 4
    dim_state_with_fake = state_dim + num_fake_features
    num_hid_neurons = 256
    action_dim = 8
    max_action = 2.0
    global_sparsity = 0.5
    fake_noise_std = 0.1
    param_dtype = jnp.bfloat16

    root = jax.random.PRNGKey(0)
    k_state, k_noise, k_params = jax.random.split(root, 3)

    state = jax.random.normal(k_state, (batch, state_dim), jnp.float32)
    params = make_actor_params(k_params, dim_state_with_fake, num_hid_neurons,
                               action_dim, global_sparsity, param_dtype)

    # forward(): add fake features, permute (permutation=None -> identity), MLP.
    x = add_fake_features(state, num_fake_features, fake_noise_std, k_noise)
    # TODO(synk): permute_features is identity while self.permutation is None.

    # block_batch=16 so the demo exercises a multi-step batch grid (4 steps).
    out = actor_forward(x, params, max_action, block_batch=16)
    out = jax.block_until_ready(out)

    # Reference in plain JAX mirroring the kernel's precision
    # (bf16 operands, f32 accumulation / epilogue).
    wf = {k: v.astype(jnp.float32) for k, v in params.items()}
    xb = x.astype(param_dtype).astype(jnp.float32)
    a = jnp.maximum(xb @ wf["w1"] + wf["b1"], 0.0)
    a = a.astype(param_dtype).astype(jnp.float32)
    a = jnp.maximum(a @ wf["w2"] + wf["b2"], 0.0)
    a = a.astype(param_dtype).astype(jnp.float32)
    ref = max_action * jnp.tanh(a @ wf["w3"] + wf["b3"])

    assert out.shape == (batch, action_dim)
    assert jnp.allclose(out, ref, atol=2e-3, rtol=2e-3), float(
        jnp.max(jnp.abs(out - ref)))

    print("KERNEL_OK")
</pallas_src>

<mosaic_0001>
module attributes {stable_mosaic.version = 11 : i64} {
  func.func @actor_mlp_kernel(%arg0: i32, %arg1: memref<16x16xbf16, #tpu.memory_space<vmem>>, %arg2: memref<16x256xbf16, #tpu.memory_space<vmem>>, %arg3: memref<1x256xf32, #tpu.memory_space<vmem>>, %arg4: memref<256x256xbf16, #tpu.memory_space<vmem>>, %arg5: memref<1x256xf32, #tpu.memory_space<vmem>>, %arg6: memref<256x8xbf16, #tpu.memory_space<vmem>>, %arg7: memref<1x8xf32, #tpu.memory_space<vmem>>, %arg8: memref<1x1xf32, #tpu.memory_space<smem>>, %arg9: memref<16x8xf32, #tpu.memory_space<vmem>>) attributes {dimension_semantics = [#tpu.dimension_semantics<parallel>], iteration_bounds = array<i64: 4>, scalar_prefetch = 0 : i64, scratch_operands = 0 : i64, tpu.core_type = #tpu.core_type<tc>, window_params = [{transform_indices = @transform_0, window_bounds = array<i64: 16, 16>}, {pipeline_mode = #tpu.pipeline_mode<synchronous>, transform_indices = @transform_1, window_bounds = array<i64: 16, 256>}, {pipeline_mode = #tpu.pipeline_mode<synchronous>, transform_indices = @transform_2, window_bounds = array<i64: 1, 256>}, {pipeline_mode = #tpu.pipeline_mode<synchronous>, transform_indices = @transform_3, window_bounds = array<i64: 256, 256>}, {pipeline_mode = #tpu.pipeline_mode<synchronous>, transform_indices = @transform_4, window_bounds = array<i64: 1, 256>}, {pipeline_mode = #tpu.pipeline_mode<synchronous>, transform_indices = @transform_5, window_bounds = array<i64: 256, 8>}, {pipeline_mode = #tpu.pipeline_mode<synchronous>, transform_indices = @transform_6, window_bounds = array<i64: 1, 8>}, {transform_indices = @transform_7, window_bounds = array<i64: 1, 1>}, {transform_indices = @transform_8, window_bounds = array<i64: 16, 8>}]} {
    %c0 = arith.constant 0 : index
    %c0_0 = arith.constant 0 : index
    %0 = vector.load %arg1[%c0, %c0_0] : memref<16x16xbf16, #tpu.memory_space<vmem>>, vector<16x16xbf16>
    %c0_1 = arith.constant 0 : index
    %c0_2 = arith.constant 0 : index
    %1 = vector.load %arg2[%c0_1, %c0_2] : memref<16x256xbf16, #tpu.memory_space<vmem>>, vector<16x256xbf16>
    %cst = arith.constant dense<0.000000e+00> : vector<16x256xf32>
    %2 = tpu.matmul %0, %1, %cst {dimension_numbers = #tpu.dot_dimension_numbers<[1], [0], [0], [1], [0, 0, 1, 1], [], []>} : vector<16x16xbf16>, vector<16x256xbf16>, vector<16x256xf32> -> vector<16x256xf32>
    %c0_3 = arith.constant 0 : index
    %c0_4 = arith.constant 0 : index
    %3 = vector.load %arg3[%c0_3, %c0_4] : memref<1x256xf32, #tpu.memory_space<vmem>>, vector<1x256xf32>
    %4 = vector.broadcast %3 : vector<1x256xf32> to vector<16x256xf32>
    %5 = arith.addf %2, %4 : vector<16x256xf32>
    %cst_5 = arith.constant 0.000000e+00 : f32
    %6 = vector.broadcast %cst_5 : f32 to vector<16x256xf32>
    %7 = arith.maximumf %5, %6 : vector<16x256xf32>
    %8 = arith.truncf %7 : vector<16x256xf32> to vector<16x256xbf16>
    %c0_6 = arith.constant 0 : index
    %c0_7 = arith.constant 0 : index
    %9 = vector.load %arg4[%c0_6, %c0_7] : memref<256x256xbf16, #tpu.memory_space<vmem>>, vector<256x256xbf16>
    %cst_8 = arith.constant dense<0.000000e+00> : vector<16x256xf32>
    %10 = tpu.matmul %8, %9, %cst_8 {dimension_numbers = #tpu.dot_dimension_numbers<[1], [0], [0], [1], [0, 0, 1, 1], [], []>} : vector<16x256xbf16>, vector<256x256xbf16>, vector<16x256xf32> -> vector<16x256xf32>
    %c0_9 = arith.constant 0 : index
    %c0_10 = arith.constant 0 : index
    %11 = vector.load %arg5[%c0_9, %c0_10] : memref<1x256xf32, #tpu.memory_space<vmem>>, vector<1x256xf32>
    %12 = vector.broadcast %11 : vector<1x256xf32> to vector<16x256xf32>
    %13 = arith.addf %10, %12 : vector<16x256xf32>
    %cst_11 = arith.constant 0.000000e+00 : f32
    %14 = vector.broadcast %cst_11 : f32 to vector<16x256xf32>
    %15 = arith.maximumf %13, %14 : vector<16x256xf32>
    %16 = arith.truncf %15 : vector<16x256xf32> to vector<16x256xbf16>
    %c0_12 = arith.constant 0 : index
    %c0_13 = arith.constant 0 : index
    %17 = vector.load %arg6[%c0_12, %c0_13] : memref<256x8xbf16, #tpu.memory_space<vmem>>, vector<256x8xbf16>
    %cst_14 = arith.constant dense<0.000000e+00> : vector<16x8xf32>
    %18 = tpu.matmul %16, %17, %cst_14 {dimension_numbers = #tpu.dot_dimension_numbers<[1], [0], [0], [1], [0, 0, 1, 1], [], []>} : vector<16x256xbf16>, vector<256x8xbf16>, vector<16x8xf32> -> vector<16x8xf32>
    %c0_15 = arith.constant 0 : index
    %c0_16 = arith.constant 0 : index
    %19 = vector.load %arg7[%c0_15, %c0_16] : memref<1x8xf32, #tpu.memory_space<vmem>>, vector<1x8xf32>
    %20 = vector.broadcast %19 : vector<1x8xf32> to vector<16x8xf32>
    %21 = arith.addf %18, %20 : vector<16x8xf32>
    %c0_17 = arith.constant 0 : index
    %c0_18 = arith.constant 0 : index
    %22 = memref.load %arg8[%c0_17, %c0_18] : memref<1x1xf32, #tpu.memory_space<smem>>
    %23 = math.tanh %21 : vector<16x8xf32>
    %24 = vector.broadcast %22 : f32 to vector<16x8xf32>
    %25 = arith.mulf %24, %23 : vector<16x8xf32>
    %c0_19 = arith.constant 0 : index
    %c0_20 = arith.constant 0 : index
    %26 = vector.load %arg9[%c0_19, %c0_20] : memref<16x8xf32, #tpu.memory_space<vmem>>, vector<16x8xf32>
    tpu.vector_store %arg9[%c0_19, %c0_20], %25 {strides = array<i32>} : memref<16x8xf32, #tpu.memory_space<vmem>>, vector<16x8xf32>,
    return
  }
  func.func @transform_0(%arg0: i32) -> (i32, i32) {
    %c0_i32 = arith.constant 0 : i32
    %c0_i32_0 = arith.constant 0 : i32
    return %arg0, %c0_i32 : i32, i32
  }
  func.func @transform_1(%arg0: i32) -> (i32, i32) {
    %c0_i32 = arith.constant 0 : i32
    %c0_i32_0 = arith.constant 0 : i32
    %c0_i32_1 = arith.constant 0 : i32
    return %c0_i32, %c0_i32_0 : i32, i32
  }
  func.func @transform_2(%arg0: i32) -> (i32, i32) {
    %c0_i32 = arith.constant 0 : i32
    %c0_i32_0 = arith.constant 0 : i32
    %c0_i32_1 = arith.constant 0 : i32
    return %c0_i32, %c0_i32_0 : i32, i32
  }
  func.func @transform_3(%arg0: i32) -> (i32, i32) {
    %c0_i32 = arith.constant 0 : i32
    %c0_i32_0 = arith.constant 0 : i32
    %c0_i32_1 = arith.constant 0 : i32
    return %c0_i32, %c0_i32_0 : i32, i32
  }
  func.func @transform_4(%arg0: i32) -> (i32, i32) {
    %c0_i32 = arith.constant 0 : i32
    %c0_i32_0 = arith.constant 0 : i32
    %c0_i32_1 = arith.constant 0 : i32
    return %c0_i32, %c0_i32_0 : i32, i32
  }
  func.func @transform_5(%arg0: i32) -> (i32, i32) {
    %c0_i32 = arith.constant 0 : i32
    %c0_i32_0 = arith.constant 0 : i32
    %c0_i32_1 = arith.constant 0 : i32
    return %c0_i32, %c0_i32_0 : i32, i32
  }
  func.func @transform_6(%arg0: i32) -> (i32, i32) {
    %c0_i32 = arith.constant 0 : i32
    %c0_i32_0 = arith.constant 0 : i32
    %c0_i32_1 = arith.constant 0 : i32
    return %c0_i32, %c0_i32_0 : i32, i32
  }
  func.func @transform_7(%arg0: i32) -> (i32, i32) {
    %c0_i32 = arith.constant 0 : i32
    %c0_i32_0 = arith.constant 0 : i32
    %c0_i32_1 = arith.constant 0 : i32
    return %c0_i32, %c0_i32_0 : i32, i32
  }
  func.func @transform_8(%arg0: i32) -> (i32, i32) {
    %c0_i32 = arith.constant 0 : i32
    %c0_i32_0 = arith.constant 0 : i32
    return %arg0, %c0_i32 : i32, i32
  }
}

</mosaic_0001>

<bundles_post_ra>
// kernel: tpu_custom_call.1
= control target key start
LH: loop header
LB: loop body
LE: loop exit
PB: predicated region body
PF: predicated region fallthrough
CT: control target
= control target key end

     0   :  { %s1372_s0 = inlined_call_operand.vmem [shape: bf16[64,16], index: 0, kind: input, shape index: {}]   ;;  %s1373_s1 = inlined_call_operand.vmem [shape: bf16[16,256], index: 1, kind: input, shape index: {}]   ;;  %s1374_s2 = inlined_call_operand.vmem [shape: f32[1,256], index: 2, kind: input, shape index: {}]   ;;  %s1375_s3 = inlined_call_operand.hbm [shape: bf16[256,256], index: 3, kind: input, shape index: {}]   ;;  %s1376_s4 = inlined_call_operand.vmem [shape: f32[1,256], index: 4, kind: input, shape index: {}]   ;;  %s1377_s5 = inlined_call_operand.vmem [shape: bf16[256,8], index: 5, kind: input, shape index: {}]   ;;  %s1378_s6 = inlined_call_operand.vmem [shape: f32[1,8], index: 6, kind: input, shape index: {}]   ;;  %s1379_s7 = inlined_call_operand.<no memory space> [shape: f32[1,1], index: 7, kind: input, shape index: {}]   ;;  %s1380_s8 = inlined_call_operand.vmem [shape: f32[64,8], index: 8, kind: output, shape index: {}]  }
   0x1   :  { %13 = sst [smem:[#allocation2]] %s1379_s7 }
   0x2   :  { %14 = vsyncpa [#allocation4], 0  ;;  %s1277_s29 = smov 0  }
   0x3 LB: > { %s241_s10 = sshll.u32 %s1375_s3, 4  ;;  %s888_s11 = sadd.s32 4294967295, %s1224_s29   ;;  %s1224_s29 = sphi %s1277_s29, %s20_s29   ;;  %s242_s10 = int_to_ptr.hbm [resolvable:$true] %s241_s10 }
   0x4   : > { %p890_p0 = scmp.ge.s32.totalorder %s1224_s29, 1  ;;  %p224_p1 = scmp.lt.s32.totalorder %s1224_s29, 5 }
   0x5   : > { %p1166_p2 = scmp.eq.s32.totalorder %s888_s11, 0  ;;  %s1226_s7 = smov [#allocation3]  }
   0x6   : > { %p225_p3 = pnand %p890_p0, %p224_p1  ;;  %s243_s12 = sshll.u32 %s1226_s7, 4  ;;  %s244_s12 = int_to_ptr.vmem [resolvable:$true] %s243_s12 }
   0x7   : > { %s1227_s13 = smov 128   ;;  %s1228_s14 = smov 8  }
   0x8   : > { %p1162_p4 = pneg %p225_p3  ;;  %280 = sbr.rel (%p225_p3) target bundleno = 463 (0x1cf), region = 52 }
   0xa   : > { %p1163_p5 = pnand %p1166_p2, %p1162_p4 }
   0xc   : > { %1165 = dma.hbm_to_vmem [thread:$0]  (!%p1163_p5), %s242_s10, 4096, %s244_s12, [#allocation4], %s1227_s13, %s1227_s13, %s1228_s14  }
   0xd   : > { %1219 = dma.done.wait (%p1166_p2), [#allocation4], 4096  }
   0xe   : > { %1221 = vsyncadd (%p1166_p2), [#allocation4], 4294963200  ;;  %s895_s15 = sshll.u32 %s888_s11, 1  ;;  %v905_v0 = vld [vmem:[%s1373_s1] sm:$0xf]  ;;  %vm353_vm0 = vcmask 130048  }
   0xf   : > { %p316_p6 = scmp.lt.s32.totalorder %s895_s15, 7  ;;  %v1109_v1 = vld [vmem:[%s1373_s1 + $0x4] sm:$0xf0]  ;;  %v1108_v2 = vld [vmem:[%s1373_s1 + $0x4] sm:$0xf]  ;;  %s811_s24 = sld [smem:[#allocation2]] }
  0x10   : > { %v906_v3 = vor.u32 %v1109_v1, %v905_v0  ;;  %v907_v4 = vld [vmem:[%s1373_s1 + $0x8] sm:$0xf0]  ;;  %v971_v6 = vld [vmem:[#allocation3 + $0x70] sm:$0xf]  ;;  %v1125_v8 = vld [vmem:[#allocation3 + $0x74] sm:$0xf0] }
  0x11   : > { %s1382_s15 = smov (!%p316_p6, %s895_s15), 7  ;;  %v910_v7 = vor.u32 %v1108_v2, %v907_v4  ;;  %v1035_v9 = vld [vmem:[#allocation3 + $0xf0] sm:$0xf]  ;;  %v1141_v10 = vld [vmem:[#allocation3 + $0xf4] sm:$0xf0]  ;;  %v972_v11 = vor.u32 %v1125_v8, %v971_v6  ;;  %vm817_vm1 = vcmask 64512  }
  0x12   : > { %s896_s16 = sshll.u32 %s1382_s15, 2  ;;  %364 = vmatpush.bf16.msra.mxu0 %v906_v3  ;;  %v1036_v12 = vor.u32 %v1141_v10, %v1035_v9  ;;  %v1124_v13 = vld [vmem:[#allocation3 + $0x74] sm:$0xf]  ;;  %v973_v14 = vld [vmem:[#allocation3 + $0x78] sm:$0xf0]  ;;  %s898_s25 = sshll.u32 %s1382_s15, 3 }
  0x13   : > { %s319_s19 = scalar_lea.vmem %s1372_s0, %s896_s16  ;;  %v1140_v15 = vld [vmem:[#allocation3 + $0xf4] sm:$0xf]  ;;  %378 = vmatpush.bf16.msra.mxu1 %v910_v7  ;;  %v976_v16 = vor.u32 %v1124_v13, %v973_v14  ;;  %v1037_v17 = vld [vmem:[#allocation3 + $0xf8] sm:$0xf0]  ;;  %v963_v18 = vld [vmem:[#allocation3 + $0x60] sm:$0xf]  ;;  %589 = vmatpush.bf16.msra.mxu2 %v972_v11  ;;  %s325_s28 = scalar_lea.vmem %s1380_s8, %s898_s25 }
  0x14   : > { %v1107_v5 = vld [vmem:[%s319_s19] sm:$0xff]  ;;  %v1123_v19 = vld [vmem:[#allocation3 + $0x64] sm:$0xf0]  ;;  %603 = vmatpush.bf16.msra.mxu3 %v1036_v12  ;;  %v1040_v20 = vor.u32 %v1140_v15, %v1037_v17  ;;  %v965_v26 = vld [vmem:[#allocation3 + $0x68] sm:$0xf0] }
  0x15   : > { %v964_v21 = vor.u32 %v1123_v19, %v963_v18  ;;  %v1027_v22 = vld [vmem:[#allocation3 + $0xe0] sm:$0xf]  ;;  %v1139_v23 = vld [vmem:[#allocation3 + $0xe4] sm:$0xf0]  ;;  %v1122_v24 = vld [vmem:[#allocation3 + $0x64] sm:$0xf]  ;;  %911 = vmatmul.msk.bf16.vlgmr.msra.gmra.mxu0 %vm353_vm0, %v1107_v5 }
  0x16   : > { %v1028_v25 = vor.u32 %v1139_v23, %v1027_v22  ;;  %v1138_v27 = vld [vmem:[#allocation3 + $0xe4] sm:$0xf]  ;;  %v1029_v28 = vld [vmem:[#allocation3 + $0xe8] sm:$0xf0]  ;;  %912 = vmatmul.msk.bf16.vlgmr.msra.gmra.mxu1 %vm353_vm0, %v1107_v5  ;;  %617 = vmatpush.bf16.msrb.mxu0 %v976_v16  ;;  %v968_v29 = vor.u32 %v1122_v24, %v965_v26  ;;  %v955_v30 = vld [vmem:[#allocation3 + $0x50] sm:$0xf] }
  0x17   : > { %v1121_v31 = vld [vmem:[#allocation3 + $0x54] sm:$0xf0]  ;;  %v1019_v32 = vld [vmem:[#allocation3 + $0xd0] sm:$0xf]  ;;  %631 = vmatpush.bf16.msrb.mxu1 %v1040_v20  ;;  %v1032_v33 = vor.u32 %v1138_v27, %v1029_v28  ;;  %v1120_v35 = vld [vmem:[#allocation3 + $0x54] sm:$0xf]  ;;  %590 = vmatpush.bf16.msra.mxu2 %v964_v21 }
  0x18   : > { %v1137_v34 = vld [vmem:[#allocation3 + $0xd4] sm:$0xf0]  ;;  %v957_v36 = vld [vmem:[#allocation3 + $0x58] sm:$0xf0]  ;;  %604 = vmatpush.bf16.msra.mxu3 %v1028_v25  ;;  %v956_v37 = vor.u32 %v1121_v31, %v955_v30  ;;  %v1136_v39 = vld [vmem:[#allocation3 + $0xd4] sm:$0xf] }
  0x19   : > { %v1020_v38 = vor.u32 %v1137_v34, %v1019_v32  ;;  %v1021_v40 = vld [vmem:[#allocation3 + $0xd8] sm:$0xf0]  ;;  %v947_v41 = vld [vmem:[#allocation3 + $0x40] sm:$0xf]  ;;  %v1119_v42 = vld [vmem:[#allocation3 + $0x44] sm:$0xf0]  ;;  %v960_v45 = vor.u32 %v1120_v35, %v957_v36 }
  0x1a   : > { %v1011_v43 = vld [vmem:[#allocation3 + $0xc0] sm:$0xf]  ;;  %v1135_v44 = vld [vmem:[#allocation3 + $0xc4] sm:$0xf0]  ;;  %618 = vmatpush.bf16.msrb.mxu0 %v968_v29  ;;  %v1024_v46 = vor.u32 %v1136_v39, %v1021_v40  ;;  %v1118_v47 = vld [vmem:[#allocation3 + $0x44] sm:$0xf]  ;;  %v948_v49 = vor.u32 %v1119_v42, %v947_v41 }
  0x1b   : > { %632 = vmatpush.bf16.msrb.mxu1 %v1032_v33  ;;  %v949_v48 = vld [vmem:[#allocation3 + $0x48] sm:$0xf0]  ;;  %591 = vmatpush.bf16.msra.mxu2 %v956_v37  ;;  %v1012_v50 = vor.u32 %v1135_v44, %v1011_v43  ;;  %v1134_v51 = vld [vmem:[#allocation3 + $0xc4] sm:$0xf]  ;;  %v939_v55 = vld [vmem:[#allocation3 + $0x30] sm:$0xf] }
  0x1c   : > { %605 = vmatpush.bf16.msra.mxu3 %v1020_v38  ;;  %v1013_v52 = vld [vmem:[#allocation3 + $0xc8] sm:$0xf0]  ;;  %v952_v53 = vor.u32 %v1118_v47, %v949_v48  ;;  %v1117_v56 = vld [vmem:[#allocation3 + $0x34] sm:$0xf0]  ;;  %v1003_v57 = vld [vmem:[#allocation3 + $0xb0] sm:$0xf] }
  0x1d   : > { %v1016_v54 = vor.u32 %v1134_v51, %v1013_v52  ;;  %v940_v58 = vor.u32 %v1117_v56, %v939_v55  ;;  %v1133_v59 = vld [vmem:[#allocation3 + $0xb4] sm:$0xf0]  ;;  %v1116_v60 = vld [vmem:[#allocation3 + $0x34] sm:$0xf]  ;;  %v941_v61 = vld [vmem:[#allocation3 + $0x38] sm:$0xf0] }
  0x1e   : > { %619 = vmatpush.bf16.msrb.mxu0 %v960_v45  ;;  %v1004_v62 = vor.u32 %v1133_v59, %v1003_v57  ;;  %v944_v63 = vor.u32 %v1116_v60, %v941_v61  ;;  %v1132_v0 = vld [vmem:[#allocation3 + $0xb4] sm:$0xf]  ;;  %v1005_v1 = vld [vmem:[#allocation3 + $0xb8] sm:$0xf0]  ;;  %v931_v3 = vld [vmem:[#allocation3 + $0x20] sm:$0xf] }
  0x1f   : > { %633 = vmatpush.bf16.msrb.mxu1 %v1024_v46  ;;  %592 = vmatpush.bf16.msra.mxu2 %v948_v49  ;;  %v1008_v2 = vor.u32 %v1132_v0, %v1005_v1  ;;  %v1115_v4 = vld [vmem:[#allocation3 + $0x24] sm:$0xf0]  ;;  %v995_v6 = vld [vmem:[#allocation3 + $0xa0] sm:$0xf]  ;;  %v1114_v8 = vld [vmem:[#allocation3 + $0x24] sm:$0xf] }
  0x20   : > { %606 = vmatpush.bf16.msra.mxu3 %v1012_v50  ;;  %v932_v5 = vor.u32 %v1115_v4, %v931_v3  ;;  %v1131_v7 = vld [vmem:[#allocation3 + $0xa4] sm:$0xf0]  ;;  %v933_v10 = vld [vmem:[#allocation3 + $0x28] sm:$0xf0]  ;;  %v1130_v11 = vld [vmem:[#allocation3 + $0xa4] sm:$0xf] }
  0x21   : > { %v996_v9 = vor.u32 %v1131_v7, %v995_v6  ;;  %v997_v12 = vld [vmem:[#allocation3 + $0xa8] sm:$0xf0]  ;;  %v936_v13 = vor.u32 %v1114_v8, %v933_v10  ;;  %v923_v15 = vld [vmem:[#allocation3 + $0x10] sm:$0xf]  ;;  %v1113_v16 = vld [vmem:[#allocation3 + $0x14] sm:$0xf0] }
  0x22   : > { %620 = vmatpush.bf16.msrb.mxu0 %v952_v53  ;;  %v1000_v14 = vor.u32 %v1130_v11, %v997_v12  ;;  %v987_v17 = vld [vmem:[#allocation3 + $0x90] sm:$0xf]  ;;  %v924_v18 = vor.u32 %v1113_v16, %v923_v15  ;;  %v1129_v19 = vld [vmem:[#allocation3 + $0x94] sm:$0xf0]  ;;  %v1112_v20 = vld [vmem:[#allocation3 + $0x14] sm:$0xf] }
  0x23   : > { %634 = vmatpush.bf16.msrb.mxu1 %v1016_v54  ;;  %593 = vmatpush.bf16.msra.mxu2 %v940_v58  ;;  %v925_v21 = vld [vmem:[#allocation3 + $0x18] sm:$0xf0]  ;;  %v988_v22 = vor.u32 %v1129_v19, %v987_v17  ;;  %v1128_v24 = vld [vmem:[#allocation3 + $0x94] sm:$0xf]  ;;  %v915_v27 = vld [vmem:[#allocation3] sm:$0xf] }
  0x24   : > { %607 = vmatpush.bf16.msra.mxu3 %v1004_v62  ;;  %v928_v23 = vor.u32 %v1112_v20, %v925_v21  ;;  %v989_v25 = vld [vmem:[#allocation3 + $0x98] sm:$0xf0]  ;;  %v1111_v28 = vld [vmem:[#allocation3 + $0x4] sm:$0xf0]  ;;  %v979_v29 = vld [vmem:[#allocation3 + $0x80] sm:$0xf] }
  0x25   : > { %v992_v26 = vor.u32 %v1128_v24, %v989_v25  ;;  %v916_v30 = vor.u32 %v1111_v28, %v915_v27  ;;  %v1127_v31 = vld [vmem:[#allocation3 + $0x84] sm:$0xf0]  ;;  %v1110_v32 = vld [vmem:[#allocation3 + $0x4] sm:$0xf]  ;;  %v917_v33 = vld [vmem:[#allocation3 + $0x8] sm:$0xf0] }
  0x26   : > { %621 = vmatpush.bf16.msrb.mxu0 %v944_v63  ;;  %v980_v34 = vor.u32 %v1127_v31, %v979_v29  ;;  %v920_v35 = vor.u32 %v1110_v32, %v917_v33  ;;  %v1126_v36 = vld [vmem:[#allocation3 + $0x84] sm:$0xf]  ;;  %v981_v37 = vld [vmem:[#allocation3 + $0x88] sm:$0xf0]  ;;  %v1157_v39 = vld [vmem:[%s1377_s5 + $0x78] sm:$0xff] }
  0x27   : > { %635 = vmatpush.bf16.msrb.mxu1 %v1008_v2  ;;  %594 = vmatpush.bf16.msra.mxu2 %v932_v5  ;;  %v984_v38 = vor.u32 %v1126_v36, %v981_v37  ;;  %v1149_v40 = vld [vmem:[%s1377_s5 + $0x38] sm:$0xff]  ;;  %v1156_v41 = vld [vmem:[%s1377_s5 + $0x70] sm:$0xff]  ;;  %v1155_v43 = vld [vmem:[%s1377_s5 + $0x68] sm:$0xff] }
  0x28   : > { %608 = vmatpush.bf16.msra.mxu3 %v996_v9  ;;  %v1148_v42 = vld [vmem:[%s1377_s5 + $0x30] sm:$0xff]  ;;  %v1154_v44 = vld [vmem:[%s1377_s5 + $0x60] sm:$0xff]  ;;  %v1147_v62 = vld [vmem:[%s1377_s5 + $0x28] sm:$0xff] }
  0x29   : > { %v332_v45 = vld [vmem:[%s1374_s2] sm:$0x3]  ;;  %v1153_v63 = vld [vmem:[%s1377_s5 + $0x58] sm:$0xff]  ;;  %v1152_v1 = vld [vmem:[%s1377_s5 + $0x50] sm:$0xff] }
  0x2a   : > { %622 = vmatpush.bf16.msrb.mxu0 %v936_v13  ;;  %v334_v48 = vperm.slane %v332_v45, 0  ;;  %v335_v49 = vperm.slane %v332_v45, 1  ;;  %v1146_v0 = vld [vmem:[%s1377_s5 + $0x20] sm:$0xff]  ;;  %v1145_v2 = vld [vmem:[%s1377_s5 + $0x18] sm:$0xff]  ;;  %v1151_v3 = vld [vmem:[%s1377_s5 + $0x48] sm:$0xff] }
  0x2b   : > { %636 = vmatpush.bf16.msrb.mxu1 %v1000_v14  ;;  %595 = vmatpush.bf16.msra.mxu2 %v924_v18  ;;  %v1144_v4 = vld [vmem:[%s1377_s5 + $0x10] sm:$0xff]  ;;  %v1150_v5 = vld [vmem:[%s1377_s5 + $0x40] sm:$0xff]  ;;  %v1143_v6 = vld [vmem:[%s1377_s5 + $0x8] sm:$0xff] }
  0x2c   : > { %609 = vmatpush.bf16.msra.mxu3 %v988_v22  ;;  %v1142_v7 = vld [vmem:[%s1377_s5] sm:$0xff] }
  0x2d   : > { %v423_v8 = vld [vmem:[%s1376_s4] sm:$0x3] }
  0x2e   : > { %623 = vmatpush.bf16.msrb.mxu0 %v928_v23  ;;  %v426_v10 = vperm.slane %v423_v8, 1  ;;  %v425_v14 = vperm.slane %v423_v8, 0  ;;  %v1179_v33 = vld [vmem:[%s1378_s6] ss:$0 sm:$0xff] }
  0x2f   : > { %637 = vmatpush.bf16.msrb.mxu1 %v992_v26  ;;  %596 = vmatpush.bf16.msra.mxu2 %v916_v30 }
  0x30   : > { %610 = vmatpush.bf16.msra.mxu3 %v980_v34 }
  0x32   : > { %624 = vmatpush.bf16.msrb.mxu0 %v920_v35 }
  0x33   : > { %638 = vmatpush.bf16.msrb.mxu1 %v984_v38  ;;  %783 = vmatpush.bf16.msrb.mxu2 %v1149_v40 }
  0x34   : > { %797 = vmatpush.bf16.msrb.mxu3 %v1157_v39  ;;  %v814_v39 = vstv %s811_s24 }
  0x37   : > { %784 = vmatpush.bf16.msrb.mxu2 %v1148_v42 }
  0x38   : > { %798 = vmatpush.bf16.msrb.mxu3 %v1156_v41 }
  0x3b   : > { %785 = vmatpush.bf16.msrb.mxu2 %v1147_v62 }
  0x3c   : > { %799 = vmatpush.bf16.msrb.mxu3 %v1155_v43 }
  0x3f   : > { %786 = vmatpush.bf16.msrb.mxu2 %v1146_v0 }
  0x40   : > { %800 = vmatpush.bf16.msrb.mxu3 %v1154_v44 }
  0x43   : > { %787 = vmatpush.bf16.msrb.mxu2 %v1145_v2 }
  0x44   : > { %801 = vmatpush.bf16.msrb.mxu3 %v1153_v63 }
  0x47   : > { %788 = vmatpush.bf16.msrb.mxu2 %v1144_v4 }
  0x48   : > { %802 = vmatpush.bf16.msrb.mxu3 %v1152_v1 }
  0x4b   : > { %789 = vmatpush.bf16.msrb.mxu2 %v1143_v6 }
  0x4c   : > { %803 = vmatpush.bf16.msrb.mxu3 %v1151_v3 }
  0x4f   : > { %790 = vmatpush.bf16.msrb.mxu2 %v1142_v7 }
  0x50   : > { %804 = vmatpush.bf16.msrb.mxu3 %v1150_v5 }
  0x92   : > { %v366_v46 = vpop.f32.mrf.mxu0 }
  0x93   : > { %v380_v47 = vpop.f32.mrf.mxu1  ;;  %v367_v50 = vadd.f32 %v366_v46, %v334_v48 }
  0x94   : > { %v381_v51 = vadd.f32 %v380_v47, %v335_v49 }
  0x95   : > { %v385_v56 = vmax.f32 %v367_v50, 0.0 }
  0x96   : > { %v386_v58 = vmax.f32 %v381_v51, 0.0 }
  0x9a   : > { %v368_v52 = vpop.f32.mrf.mxu0 }
  0x9b   : > { %v369_v53 = vadd.f32 %v368_v52, %v334_v48  ;;  %v382_v54 = vpop.f32.mrf.mxu1 }
  0x9c   : > { %v383_v55 = vadd.f32 %v382_v54, %v335_v49 }
  0x9d   : > { %v387_v57 = vmax.f32 %v369_v53, 0.0 }
  0x9e   : > { %v388_v59 = vmax.f32 %v383_v55, 0.0 }
  0x9f   : > { %v389_v60 = vpack.c.bf16 %v387_v57, %v385_v56 }
  0xa0   : > { %v390_v61 = vpack.c.bf16 %v388_v59, %v386_v58 }
  0xa1   : > { %597 = vmatmul.bf16.vlgmr.msra.gmra.mxu2 %v389_v60  ;;  %625 = vmatmul.bf16.vlgmr.msrb.gmra.mxu0 %v389_v60 }
  0xa2   : > { %611 = vmatmul.bf16.vlgmr.msra.gmra.mxu3 %v390_v61  ;;  %639 = vmatmul.bf16.vlgmr.msrb.gmra.mxu1 %v390_v61 }
 0x11e   : > { %v626_v9 = vpop.f32.mrf.mxu0 }
 0x11f   : > { %v640_v11 = vpop.f32.mrf.mxu1  ;;  %v627_v12 = vadd.f32 %v626_v9, %v426_v10 }
 0x121   : > { %v641_v17 = vadd.f32 %v640_v11, %v627_v12 }
 0x123   : > { %v646_v22 = vmax.f32 %v641_v17, 0.0 }
 0x124   : > { %v598_v13 = vpop.f32.mrf.mxu2 }
 0x125   : > { %v612_v15 = vpop.f32.mrf.mxu3  ;;  %v599_v20 = vadd.f32 %v598_v13, %v425_v14 }
 0x126   : > { %v628_v16 = vpop.f32.mrf.mxu0 }
 0x127   : > { %v629_v18 = vadd.f32 %v628_v16, %v426_v10  ;;  %v642_v19 = vpop.f32.mrf.mxu1  ;;  %v613_v25 = vadd.f32 %v612_v15, %v599_v20 }
 0x129   : > { %v643_v21 = vadd.f32 %v642_v19, %v629_v18  ;;  %v645_v30 = vmax.f32 %v613_v25, 0.0 }
 0x12b   : > { %v648_v23 = vmax.f32 %v643_v21, 0.0 }
 0x12c   : > { %v600_v24 = vpop.f32.mrf.mxu2 }
 0x12d   : > { %v650_v26 = vpack.c.bf16 %v648_v23, %v646_v22  ;;  %v601_v27 = vadd.f32 %v600_v24, %v425_v14  ;;  %v614_v28 = vpop.f32.mrf.mxu3 }
 0x12f   : > { %v615_v29 = vadd.f32 %v614_v28, %v601_v27  ;;  %805 = vmatmul.bf16.vlgmr.msrb.gmra.mxu3 %v650_v26 }
 0x131   : > { %v647_v31 = vmax.f32 %v615_v29, 0.0 }
 0x133   : > { %v649_v32 = vpack.c.bf16 %v647_v31, %v645_v30 }
 0x135   : > { %791 = vmatmul.bf16.vlgmr.msrb.gmra.mxu2 %v649_v32 }
 0x1b2   : > { %v806_v34 = vpop.f32.mrf.mxu3 }
 0x1b8   : > { %v792_v35 = vpop.f32.mrf.mxu2 }
 0x1b9   : > { %v793_v36 = vadd.f32 %v1179_v33, %v792_v35 }
 0x1ba   : > { %v808_v41 = vpop.f32.mrf.mxu3 }
 0x1bb   : > { %v807_v37 = vadd.f32 %v806_v34, %v793_v36 }
 0x1bd   : > { %1180 = vtanh.f32 %v807_v37 }
 0x1c0   : > { %v794_v38 = vpop.f32.mrf.mxu2 }
 0x1c1   : > { %v795_v40 = vadd.f32 %v1179_v33, %v794_v38 }
 0x1c3   : > { %v1181_v42 = vpop.eup %1180  ;;  %v809_v43 = vadd.f32 %v808_v41, %v795_v40 }
 0x1c4   : > { %v815_v44 = vmul.f32 %v1181_v42, %v814_v39 }
 0x1c5   : > { %1182 = vtanh.f32 %v809_v43 }
 0x1c6   : > { %818 = vst.msk [vmem:[%s325_s28] sm:$0xff] %vm817_vm1, %v815_v44 }
 0x1cb   : > { %v1183_v45 = vpop.eup %1182 }
 0x1cc   : > { %v816_v46 = vmul.f32 %v1183_v45, %v814_v39 }
 0x1ce   : > { %819 = vst.msk [vmem:[%s325_s28 + $0x8] sm:$0xff] %vm817_vm1, %v816_v46 }
 0x1cf PF: > { %s20_s29 = sadd.s32 1, %s1224_s29  }
 0x1d0   : > { %p17_p7 = scmp.ge.s32.totalorder %s20_s29, 6  }
 0x1d2   :  { %19 = sbr.rel (!%p17_p7) target bundleno = 3 (0x3), region = 87 }
 0x1d7   :  { %842 = vsyncpa [#allocation4], 1 }
 0x1d8   :  { %844 = vsyncpa [#allocation4 + $0x1], 1 }

</bundles_post_ra>
